<compile_context>
chip_gen: v7x
topology: tpu7x:2x2x1
jax: 0.10.0
libtpu: 0.0.40
codegen_flags: <defaults>
</compile_context>

<pallas_src>
import functools

import jax
import jax.numpy as jnp
from jax.experimental import pallas as pl
from jax.experimental.pallas import tpu as pltpu

HIDDEN = 100          # fixed by the module definition
LANE = 128            # TPU lane width (hidden dim padded to this for matmul K)
DEFAULT_TILE_B = 4096


def _round_up(x, m):
    return (x + m - 1) // m * m


# --------------------------------------------------------------------------
# Kernels
# --------------------------------------------------------------------------
def _dqn_kernel(x_ref, w1_ref, b1_ref, w2_ref, b2_ref, q_ref, act_ref):
    # x.float()
    x = x_ref[...].astype(jnp.float32)
    # fc[0]: Linear(input_shape, 100)  (hidden padded to 128 lanes, zeros beyond)
    h = jnp.dot(x, w1_ref[...], preferred_element_type=jnp.float32) + b1_ref[...]
    # fc[1]: ReLU  (saved as "activations", stored un-padded: 100 lanes)
    h = jnp.maximum(h, 0.0)
    act_ref[...] = h[:, :HIDDEN]
    # fc[2]: Linear(100, n_actions)  (contracts over K=128; padded rows are zero)
    q_ref[...] = (
        jnp.dot(h, w2_ref[...], preferred_element_type=jnp.float32) + b2_ref[...]
    )


def _dqn_kernel_q_only(x_ref, w1_ref, b1_ref, w2_ref, b2_ref, q_ref):
    x = x_ref[...].astype(jnp.float32)
    h = jnp.dot(x, w1_ref[...], preferred_element_type=jnp.float32) + b1_ref[...]
    h = jnp.maximum(h, 0.0)
    q_ref[...] = (
        jnp.dot(h, w2_ref[...], preferred_element_type=jnp.float32) + b2_ref[...]
    )


# --------------------------------------------------------------------------
# Wrapper
# --------------------------------------------------------------------------
def _vmem_footprint(tile_b, f, n_actions, in_bytes, save_activations):
    per_row = (
        2 * f * in_bytes                       # double-buffered x blocks
        + 2 * 4 * n_actions                    # double-buffered q blocks
        + (2 * 4 * HIDDEN if save_activations else 0)  # double-buffered act blocks
        + 4 * f                                # f32 cast of x (compute temp)
        + 4 * LANE                             # padded hidden activations (temp)
    )
    weights = 2 * 4 * (f * LANE + LANE + LANE * n_actions + n_actions)
    return tile_b * per_row + weights


@functools.partial(jax.jit, static_argnames=("save_activations", "tile_b"))
def dqn_forward(x, padded_params, save_activations=True, tile_b=DEFAULT_TILE_B):
    """Fused MLP forward.

    `padded_params` must come from `pad_params` (padding hoisted out of the
    per-call path).  Returns (q_values, relu_activations) when
    save_activations=True, otherwise just q_values.
    """
    w1p, b1p, w2p, b2p = padded_params
    B, F = x.shape
    n_actions = w2p.shape[1]
    in_bytes = jnp.dtype(x.dtype).itemsize

    # ---- batch tiling (all trace-time Python ints) -------------------------
    tile_b = int(tile_b)
    if tile_b >= B:
        if B >= 16:
            # split into >=2 tiles so the "parallel" batch axis can use both
            # TensorCores on v7x (harmless on single-TC chips).
            tile_b = _round_up((B + 1) // 2, 8)
        else:
            tile_b = B            # full-dim block is always a legal block shape
    else:
        tile_b = max(8, _round_up(tile_b, 8))   # (8,128) sublane constraint

    # keep the double-buffered footprint comfortably inside scoped VMEM
    budget = 24 * 1024 * 1024
    while tile_b > 8 and _vmem_footprint(
        tile_b, F, n_actions, in_bytes, save_activations
    ) > budget:
        tile_b = max(8, _round_up(tile_b // 2, 8))

    num_tiles = pl.cdiv(B, tile_b)
    grid = (num_tiles,)

    row_spec = lambda last: pl.BlockSpec((tile_b, last), lambda i: (i, 0))
    pinned = lambda shape: pl.BlockSpec(shape, lambda i: (0, 0))

    in_specs = [
        row_spec(F),                  # x tile (ragged last tile handled by Pallas)
        pinned((F, LANE)),            # w1 (VMEM-resident across grid steps)
        pinned((1, LANE)),            # b1
        pinned((LANE, n_actions)),    # w2
        pinned((1, n_actions)),       # b2
    ]

    # ---- cost estimate (de-padded byte counts) -----------------------------
    flops = 2 * B * (F * LANE + LANE * n_actions)
    weight_bytes = 4 * (F * LANE + LANE + LANE * n_actions + n_actions)
    bytes_accessed = B * F * in_bytes + 4 * B * n_actions + weight_bytes
    if save_activations:
        bytes_accessed += 4 * B * HIDDEN
    cost = pl.CostEstimate(flops=flops, transcendentals=0,
                           bytes_accessed=bytes_accessed)

    footprint = _vmem_footprint(tile_b, F, n_actions, in_bytes, save_activations)
    vmem_limit = None
    if footprint > 12 * 1024 * 1024:        # v5e default scoped limit is 16 MiB
        vmem_limit = int(min(max(2 * footprint, 16 << 20), 48 << 20))

    compiler_params = pltpu.CompilerParams(
        dimension_semantics=("parallel",),   # shard batch tiles across TCs (v7x)
        vmem_limit_bytes=vmem_limit,
    )

    if save_activations:
        out_shapes = (
            jax.ShapeDtypeStruct((B, n_actions), jnp.float32),   # q (un-padded)
            jax.ShapeDtypeStruct((B, HIDDEN), jnp.float32),      # acts (un-padded)
        )
        q, acts = pl.pallas_call(
            _dqn_kernel,
            out_shape=out_shapes,
            grid=grid,
            in_specs=in_specs,
            out_specs=(row_spec(n_actions), row_spec(HIDDEN)),
            compiler_params=compiler_params,
            cost_estimate=cost,
        )(x, w1p, b1p, w2p, b2p)
        return q, acts
    else:
        q = pl.pallas_call(
            _dqn_kernel_q_only,
            out_shape=jax.ShapeDtypeStruct((B, n_actions), jnp.float32),
            grid=grid,
            in_specs=in_specs,
            out_specs=row_spec(n_actions),
            compiler_params=compiler_params,
            cost_estimate=cost,
        )(x, w1p, b1p, w2p, b2p)
        return q


# --------------------------------------------------------------------------
# Parameters
# --------------------------------------------------------------------------
def init_params(key, input_shape, n_actions):
    """Deterministic init matching nn.Linear shapes (stored transposed)."""
    k1, k2, k3, k4 = jax.random.split(key, 4)
    lim1 = 1.0 / jnp.sqrt(input_shape)
    lim2 = 1.0 / jnp.sqrt(HIDDEN)
    w1 = jax.random.uniform(k1, (input_shape, HIDDEN), jnp.float32, -lim1, lim1)
    b1 = jax.random.uniform(k2, (1, HIDDEN), jnp.float32, -lim1, lim1)
    w2 = jax.random.uniform(k3, (HIDDEN, n_actions), jnp.float32, -lim2, lim2)
    b2 = jax.random.uniform(k4, (1, n_actions), jnp.float32, -lim2, lim2)
    return w1, b1, w2, b2


def pad_params(params):
    """Zero-pad the hidden dim to 128 once, outside the per-call hot path."""
    w1, b1, w2, b2 = params
    F = w1.shape[0]
    n_actions = w2.shape[1]
    w1p = jnp.zeros((F, LANE), jnp.float32).at[:, :HIDDEN].set(w1)
    b1p = jnp.zeros((1, LANE), jnp.float32).at[:, :HIDDEN].set(b1.reshape(1, HIDDEN))
    w2p = jnp.zeros((LANE, n_actions), jnp.float32).at[:HIDDEN, :].set(w2)
    b2p = jnp.asarray(b2, jnp.float32).reshape(1, n_actions)
    return w1p, b1p, w2p, b2p


# --------------------------------------------------------------------------
if __name__ == "__main__":
    key = jax.random.PRNGKey(0)
    k_params, k_x, k_x2 = jax.random.split(key, 3)

    batch = 8
    input_shape = 32   # feature dimension of the observation vector
    n_actions = 4

    params = init_params(k_params, input_shape, n_actions)
    padded = pad_params(params)
    x = jax.random.normal(k_x, (batch, input_shape), dtype=jnp.float32)

    # save_activations=True path (the module's well-defined forward).
    q, acts = dqn_forward(x, padded, save_activations=True)
    q = jax.block_until_ready(q)
    acts = jax.block_until_ready(acts)

    # q-only fast path (skips the (B, 100) activation writeback).
    q_only = jax.block_until_ready(dqn_forward(x, padded, save_activations=False))

    # Pure-JAX reference check.
    w1, b1, w2, b2 = params
    h_ref = jnp.maximum(x @ w1 + b1, 0.0)
    q_ref = h_ref @ w2 + b2
    assert q.shape == (batch, n_actions)
    assert acts.shape == (batch, HIDDEN)
    assert jnp.allclose(q, q_ref, atol=1e-5)
    assert jnp.allclose(acts, h_ref, atol=1e-5)
    assert jnp.allclose(q_only, q_ref, atol=1e-5)

    # Multi-tile + ragged last tile check (B not a multiple of tile_b).
    batch2 = 300
    x2 = jax.random.normal(k_x2, (batch2, input_shape), dtype=jnp.float32)
    q2, acts2 = dqn_forward(x2, padded, save_activations=True, tile_b=128)
    q2 = jax.block_until_ready(q2)
    acts2 = jax.block_until_ready(acts2)
    h2_ref = jnp.maximum(x2 @ w1 + b1, 0.0)
    q2_ref = h2_ref @ w2 + b2
    assert q2.shape == (batch2, n_actions)
    assert acts2.shape == (batch2, HIDDEN)
    assert jnp.allclose(q2, q2_ref, atol=1e-5)
    assert jnp.allclose(acts2, h2_ref, atol=1e-5)

    print("KERNEL_OK")
</pallas_src>

<mosaic_0001>
module attributes {stable_mosaic.version = 11 : i64} {
  func.func @_dqn_kernel(%arg0: i32, %arg1: memref<8x32xf32, #tpu.memory_space<vmem>>, %arg2: memref<32x128xf32, #tpu.memory_space<vmem>>, %arg3: memref<1x128xf32, #tpu.memory_space<vmem>>, %arg4: memref<128x4xf32, #tpu.memory_space<vmem>>, %arg5: memref<1x4xf32, #tpu.memory_space<vmem>>, %arg6: memref<8x4xf32, #tpu.memory_space<vmem>>, %arg7: memref<8x100xf32, #tpu.memory_space<vmem>>) attributes {dimension_semantics = [#tpu.dimension_semantics<parallel>], iteration_bounds = array<i64: 1>, scalar_prefetch = 0 : i64, scratch_operands = 0 : i64, tpu.core_type = #tpu.core_type<tc>, window_params = [{transform_indices = @transform_0, window_bounds = array<i64: 8, 32>}, {pipeline_mode = #tpu.pipeline_mode<synchronous>, transform_indices = @transform_1, window_bounds = array<i64: 32, 128>}, {pipeline_mode = #tpu.pipeline_mode<synchronous>, transform_indices = @transform_2, window_bounds = array<i64: 1, 128>}, {pipeline_mode = #tpu.pipeline_mode<synchronous>, transform_indices = @transform_3, window_bounds = array<i64: 128, 4>}, {pipeline_mode = #tpu.pipeline_mode<synchronous>, transform_indices = @transform_4, window_bounds = array<i64: 1, 4>}, {transform_indices = @transform_5, window_bounds = array<i64: 8, 4>}, {transform_indices = @transform_6, window_bounds = array<i64: 8, 100>}]} {
    %c0 = arith.constant 0 : index
    %c0_0 = arith.constant 0 : index
    %0 = vector.load %arg1[%c0, %c0_0] : memref<8x32xf32, #tpu.memory_space<vmem>>, vector<8x32xf32>
    %c0_1 = arith.constant 0 : index
    %c0_2 = arith.constant 0 : index
    %1 = vector.load %arg2[%c0_1, %c0_2] : memref<32x128xf32, #tpu.memory_space<vmem>>, vector<32x128xf32>
    %cst = arith.constant dense<0.000000e+00> : vector<8x128xf32>
    %2 = tpu.matmul %0, %1, %cst {dimension_numbers = #tpu.dot_dimension_numbers<[1], [0], [0], [1], [0, 0, 1, 1], [], []>} : vector<8x32xf32>, vector<32x128xf32>, vector<8x128xf32> -> vector<8x128xf32>
    %c0_3 = arith.constant 0 : index
    %c0_4 = arith.constant 0 : index
    %3 = vector.load %arg3[%c0_3, %c0_4] : memref<1x128xf32, #tpu.memory_space<vmem>>, vector<1x128xf32>
    %4 = vector.broadcast %3 : vector<1x128xf32> to vector<8x128xf32>
    %5 = arith.addf %2, %4 : vector<8x128xf32>
    %cst_5 = arith.constant 0.000000e+00 : f32
    %6 = vector.broadcast %cst_5 : f32 to vector<8x128xf32>
    %7 = arith.maximumf %5, %6 : vector<8x128xf32>
    %8 = vector.extract_strided_slice %7 {offsets = [0, 0], sizes = [8, 100], strides = [1, 1]} : vector<8x128xf32> to vector<8x100xf32>
    %c0_6 = arith.constant 0 : index
    %c0_7 = arith.constant 0 : index
    %9 = vector.load %arg7[%c0_6, %c0_7] : memref<8x100xf32, #tpu.memory_space<vmem>>, vector<8x100xf32>
    tpu.vector_store %arg7[%c0_6, %c0_7], %8 {strides = array<i32>} : memref<8x100xf32, #tpu.memory_space<vmem>>, vector<8x100xf32>,
    %c0_8 = arith.constant 0 : index
    %c0_9 = arith.constant 0 : index
    %10 = vector.load %arg4[%c0_8, %c0_9] : memref<128x4xf32, #tpu.memory_space<vmem>>, vector<128x4xf32>
    %cst_10 = arith.constant dense<0.000000e+00> : vector<8x4xf32>
    %11 = tpu.matmul %7, %10, %cst_10 {dimension_numbers = #tpu.dot_dimension_numbers<[1], [0], [0], [1], [0, 0, 1, 1], [], []>} : vector<8x128xf32>, vector<128x4xf32>, vector<8x4xf32> -> vector<8x4xf32>
    %c0_11 = arith.constant 0 : index
    %c0_12 = arith.constant 0 : index
    %12 = vector.load %arg5[%c0_11, %c0_12] : memref<1x4xf32, #tpu.memory_space<vmem>>, vector<1x4xf32>
    %13 = vector.broadcast %12 : vector<1x4xf32> to vector<8x4xf32>
    %14 = arith.addf %11, %13 : vector<8x4xf32>
    %c0_13 = arith.constant 0 : index
    %c0_14 = arith.constant 0 : index
    %15 = vector.load %arg6[%c0_13, %c0_14] : memref<8x4xf32, #tpu.memory_space<vmem>>, vector<8x4xf32>
    tpu.vector_store %arg6[%c0_13, %c0_14], %14 {strides = array<i32>} : memref<8x4xf32, #tpu.memory_space<vmem>>, vector<8x4xf32>,
    return
  }
  func.func @transform_0(%arg0: i32) -> (i32, i32) {
    %c0_i32 = arith.constant 0 : i32
    %c0_i32_0 = arith.constant 0 : i32
    return %arg0, %c0_i32 : i32, i32
  }
  func.func @transform_1(%arg0: i32) -> (i32, i32) {
    %c0_i32 = arith.constant 0 : i32
    %c0_i32_0 = arith.constant 0 : i32
    %c0_i32_1 = arith.constant 0 : i32
    return %c0_i32, %c0_i32_0 : i32, i32
  }
  func.func @transform_2(%arg0: i32) -> (i32, i32) {
    %c0_i32 = arith.constant 0 : i32
    %c0_i32_0 = arith.constant 0 : i32
    %c0_i32_1 = arith.constant 0 : i32
    return %c0_i32, %c0_i32_0 : i32, i32
  }
  func.func @transform_3(%arg0: i32) -> (i32, i32) {
    %c0_i32 = arith.constant 0 : i32
    %c0_i32_0 = arith.constant 0 : i32
    %c0_i32_1 = arith.constant 0 : i32
    return %c0_i32, %c0_i32_0 : i32, i32
  }
  func.func @transform_4(%arg0: i32) -> (i32, i32) {
    %c0_i32 = arith.constant 0 : i32
    %c0_i32_0 = arith.constant 0 : i32
    %c0_i32_1 = arith.constant 0 : i32
    return %c0_i32, %c0_i32_0 : i32, i32
  }
  func.func @transform_5(%arg0: i32) -> (i32, i32) {
    %c0_i32 = arith.constant 0 : i32
    %c0_i32_0 = arith.constant 0 : i32
    return %arg0, %c0_i32 : i32, i32
  }
  func.func @transform_6(%arg0: i32) -> (i32, i32) {
    %c0_i32 = arith.constant 0 : i32
    %c0_i32_0 = arith.constant 0 : i32
    return %arg0, %c0_i32 : i32, i32
  }
}

</mosaic_0001>

<bundles_post_ra>
// kernel: dqn_forward.1
= control target key start
LH: loop header
LB: loop body
LE: loop exit
PB: predicated region body
PF: predicated region fallthrough
CT: control target
= control target key end

     0   :  { %v354_v3 = vmov 0.0|0.0   ;;  %vm355_vm0 = vmmov 0   ;;  %v356_v6 = vmov 0.0   ;;  %s477_s0 = inlined_call_operand.vmem [shape: f32[8,32], index: 0, kind: input, shape index: {}]   ;;  %s478_s1 = inlined_call_operand.vmem [shape: f32[32,128], index: 1, kind: input, shape index: {}]   ;;  %s479_s2 = inlined_call_operand.vmem [shape: f32[1,128], index: 2, kind: input, shape index: {}]   ;;  %s480_s3 = inlined_call_operand.vmem [shape: f32[128,4], index: 3, kind: input, shape index: {}]   ;;  %s481_s4 = inlined_call_operand.vmem [shape: f32[1,4], index: 4, kind: input, shape index: {}]   ;;  %s482_s5 = inlined_call_operand.vmem [shape: f32[8,4], index: 5, kind: output, shape index: {0}]   ;;  %s483_s6 = inlined_call_operand.hbm [shape: f32[8,100], index: 6, kind: output, shape index: {1}]  }
   0x1   :  { %v24_v0 = vld [vmem:[%s478_s1] sm:$0xff]  ;;  %v25_v1 = vld [vmem:[%s478_s1 + $0x8] sm:$0xff]  ;;  %v26_v2 = vld [vmem:[%s478_s1 + $0x10] sm:$0xff]  ;;  %296 = vmatprep.subr.bf16.mxu0 %v354_v3  ;;  %258 = vmatprep.mubr.msk.f32.mxu0 %vm355_vm0, %v356_v6 }
   0x2   :  { %v297_v4 = vpack.c.bf16 %v25_v1, %v24_v0  ;;  %v27_v5 = vld [vmem:[%s478_s1 + $0x18] sm:$0xff]  ;;  %v112_v7 = vld [vmem:[%s480_s3] sm:$0xff]  ;;  %302 = vmatprep.subr.bf16.mxu1 %v354_v3  ;;  %v113_v8 = vld [vmem:[%s480_s3 + $0x8] sm:$0xff]  ;;  %293 = vmatprep.mubr.msk.f32.mxu1 %vm355_vm0, %v356_v6 }
   0x3   :  { %v114_v9 = vld [vmem:[%s480_s3 + $0x10] sm:$0xff]  ;;  %v115_v10 = vld [vmem:[%s480_s3 + $0x18] sm:$0xff]  ;;  %v300_v11 = vpack.c.bf16 %v27_v5, %v26_v2  ;;  %v303_v12 = vpack.c.bf16 %v113_v8, %v112_v7  ;;  %v116_v14 = vld [vmem:[%s480_s3 + $0x20] sm:$0xff] }
   0x4   :  { %298 = vmatpush3.bf16.msra.mxu0 %v297_v4  ;;  %v306_v13 = vpack.c.bf16 %v115_v10, %v114_v9  ;;  %v117_v15 = vld [vmem:[%s480_s3 + $0x28] sm:$0xff] }
   0x5   :  { %299 = vmatprep.subr.bf16.mxu0 %v354_v3  ;;  %304 = vmatpush3.bf16.msra.mxu1 %v303_v12 }
   0x6   :  { %305 = vmatprep.subr.bf16.mxu1 %v354_v3 }
   0x7   :  { %12 = vsyncpa [#allocation3], 0  ;;  %v23_v16 = vld [vmem:[%s477_s0] sm:$0xff]  ;;  %vm35_vm1 = vcmask 261120   ;;  %v309_v17 = vpack.c.bf16 %v117_v15, %v116_v14  ;;  %v118_v18 = vld [vmem:[%s480_s3 + $0x30] sm:$0xff]  ;;  %vm110_vm2 = vcmask 818176  }
   0x8   :  { %301 = vmatpush3.bf16.msra.mxu0 %v300_v11  ;;  %v119_v19 = vld [vmem:[%s480_s3 + $0x38] sm:$0xff]  ;;  %v120_v21 = vld [vmem:[%s480_s3 + $0x40] sm:$0xff]  ;;  %v121_v22 = vld [vmem:[%s480_s3 + $0x48] sm:$0xff]  ;;  %s357_s14 = smov [#allocation2]  }
   0x9   :  { %307 = vmatpush3.bf16.msra.mxu1 %v306_v13  ;;  %v312_v20 = vpack.c.bf16 %v119_v19, %v118_v18  ;;  %v315_v23 = vpack.c.bf16 %v121_v22, %v120_v21  ;;  %v122_v24 = vld [vmem:[%s480_s3 + $0x50] sm:$0xff]  ;;  %v123_v25 = vld [vmem:[%s480_s3 + $0x58] sm:$0xff]  ;;  %v124_v27 = vld [vmem:[%s480_s3 + $0x60] sm:$0xff]  ;;  %s215_s15 = sshll.u32 %s357_s14, 4  ;;  %s216_s15 = int_to_ptr.vmem [resolvable:$true] %s215_s15 }
   0xa   :  { %308 = vmatprep.subr.bf16.mxu1 %v354_v3  ;;  %v318_v26 = vpack.c.bf16 %v123_v25, %v122_v24  ;;  %v125_v28 = vld [vmem:[%s480_s3 + $0x68] sm:$0xff]  ;;  %v126_v30 = vld [vmem:[%s480_s3 + $0x70] sm:$0xff]  ;;  %v127_v31 = vld [vmem:[%s480_s3 + $0x78] sm:$0xff]  ;;  %s330_s16 = scalar_lea.vmem %s216_s15, 128  ;;  %p335_p1 = scmp.lt.s32.totalorder %s216_s15, %s216_s15 }
   0xb   :  { %259 = vmatmul.mubr.msk.f32.vlgmr.msra.gmra.mrb[0].mxu0 %vm35_vm1, %v23_v16  ;;  %v321_v29 = vpack.c.bf16 %v125_v28, %v124_v27  ;;  %v324_v32 = vpack.c.bf16 %v127_v31, %v126_v30  ;;  %v225_v33 = vld [vmem:[%s479_s2] ss:$0 sm:$0xff]  ;;  %p331_p0 = scmp.ne.s32.totalorder %s216_s15, %s330_s16  ;;  %p336_p2 = scmp.lt.s32.totalorder %s330_s16, %s330_s16 }
   0xd   :  { %310 = vmatpush3.bf16.msra.mxu1 %v309_v17  ;;  %p337_p3 = por %p336_p2, %p335_p1 }
   0xe   :  { %311 = vmatprep.subr.bf16.mxu1 %v354_v3 }
   0xf   :  { %p338_p4 = pnand %p337_p3, %p331_p0 }
  0x11   :  { %313 = vmatpush3.bf16.msra.mxu1 %v312_v20 }
  0x12   :  { %314 = vmatprep.subr.bf16.mxu1 %v354_v3 }
  0x15   :  { %316 = vmatpush3.bf16.msra.mxu1 %v315_v23 }
  0x16   :  { %317 = vmatprep.subr.bf16.mxu1 %v354_v3 }
  0x19   :  { %319 = vmatpush3.bf16.msra.mxu1 %v318_v26 }
  0x1a   :  { %320 = vmatprep.subr.bf16.mxu1 %v354_v3 }
  0x1d   :  { %322 = vmatpush3.bf16.msra.mxu1 %v321_v29 }
  0x1e   :  { %323 = vmatprep.subr.bf16.mxu1 %v354_v3 }
  0x21   :  { %325 = vmatpush3.bf16.msra.mxu1 %v324_v32 }
  0xde   :  { %v105_v34 = vpop.f32.mrb[0].mxu0 }
  0xdf   :  { %v106_v35 = vadd.f32 %v225_v33, %v105_v34  ;;  %v260_v36 = vpop.f32.mrb[1].mxu0 }
  0xe1   :  { %v109_v37 = vmax.f32 %v106_v35, 0.0 }
  0xe3   :  { %294 = vmatmul.mubr.f32.vlgmr.msra.gmra.mrb[0].mxu1 %v109_v37  ;;  %111 = vst.msk [vmem:[#allocation2] sm:$0xff] %vm110_vm2, %v109_v37 }
  0xe4   :  { %341 = shalt.err (!%p338_p4)
}
  0xe5   :  { %s342_s2 = scalar_lea.hbm %s483_s6, 128 }
  0xe6   :  { %p343_p5 = scmp.ne.s32.totalorder %s483_s6, %s342_s2  ;;  %p346_p6 = scmp.lt.u32.totalorder %s342_s2, %s483_s6 }
  0xe8   :  { %p348_p7 = pnand %p346_p6, %p343_p5 }
  0xea   :  { %351 = shalt.err (!%p348_p7)
}
  0xeb   :  { %218 = dma.vmem_to_hbm [thread:$0]  %s216_s15, 128, %s483_s6, [#allocation3]   ;;  %v227_v38 = vld [vmem:[%s481_s4] ss:$0 sm:$0xff]  ;;  %vm205_vm3 = vcmask 31744  }
 0x1b6   :  { %v201_v39 = vpop.f32.mrb[0].mxu1 }
 0x1b7   :  { %v202_v40 = vadd.f32 %v227_v38, %v201_v39  ;;  %v295_v41 = vpop.f32.mrb[1].mxu1 }
 0x1b9   :  { %206 = vst.msk [vmem:[%s482_s5] sm:$0xff] %vm205_vm3, %v202_v40 }
 0x1ba   :  { %352 = dma.done.wait [#allocation3], 128  }
 0x1bb   :  { %353 = vsyncadd [#allocation3], 4294967168 }
 0x1bc   :  { %224 = vsyncpa [#allocation3], 1 }

</bundles_post_ra>
